<compile_context>
chip_gen: v7x
topology: tpu7x:2x2x1
jax: 0.10.0
libtpu: 0.0.40
codegen_flags: <defaults>
</compile_context>

<pallas_src>
import jax
import jax.numpy as jnp
from jax.experimental import pallas as pl
from jax.experimental.pallas import tpu as pltpu

_LANES = 128


def _linear_kernel(wb_ref, x_ref, o_ref):
    # wb_ref: SMEM (2,) -> [w, b] scalars
    # x_ref, o_ref: VMEM lane-dense tiles (rows, 128)
    w = wb_ref[0]
    b = wb_ref[1]
    o_ref[...] = x_ref[...] * w + b  # VPU FMA; no MXU for a 1x1 "matmul"


def linear_forward(x, w, b, *, row_block=512):
    """y = x @ w.T + b   with x: (N, 1), w: (1, 1), b: (1,)."""
    n, f_in = x.shape
    assert f_in == 1 and w.shape == (1, 1) and b.shape == (1,)
    dtype = x.dtype

    # Lane-dense repack in the wrapper: pad N up to a multiple of 128 and put
    # the batch dimension on the lane axis.
    n_pad = pl.cdiv(n, _LANES) * _LANES
    rows = n_pad // _LANES
    x_flat = jnp.pad(x[:, 0], (0, n_pad - n)).reshape(rows, _LANES)

    # Pack w and b into one SMEM scalar block.
    wb = jnp.concatenate([w.reshape(1), b.reshape(1)]).astype(dtype)  # (2,)

    if rows <= row_block:
        # Tiny problem: single full-array block, no grid (no per-step overhead).
        y_pad = pl.pallas_call(
            _linear_kernel,
            out_shape=jax.ShapeDtypeStruct((rows, _LANES), dtype),
            in_specs=[
                pl.BlockSpec(memory_space=pltpu.SMEM),            # wb scalars
                pl.BlockSpec((rows, _LANES), lambda: (0, 0)),     # x, lane-dense
            ],
            out_specs=pl.BlockSpec((rows, _LANES), lambda: (0, 0)),
        )(wb, x_flat)
    else:
        # Scaled-up template: tile over rows, lane-dense blocks, megacore-parallel.
        rows_pad = pl.cdiv(rows, row_block) * row_block
        x_flat = jnp.pad(x_flat, ((0, rows_pad - rows), (0, 0)))
        y_pad = pl.pallas_call(
            _linear_kernel,
            out_shape=jax.ShapeDtypeStruct((rows_pad, _LANES), dtype),
            grid_spec=pltpu.PrefetchScalarGridSpec(
                num_scalar_prefetch=0,
                grid=(rows_pad // row_block,),
                in_specs=[
                    pl.BlockSpec(memory_space=pltpu.SMEM),
                    pl.BlockSpec((row_block, _LANES), lambda i: (i, 0)),
                ],
                out_specs=pl.BlockSpec((row_block, _LANES), lambda i: (i, 0)),
            ),
            compiler_params=pltpu.CompilerParams(
                dimension_semantics=("parallel",),
                vmem_limit_bytes=32 << 20,  # safe on v7x's smaller VMEM
            ),
        )(wb, x_flat)
        y_pad = y_pad[:rows]

    # Drop the lane padding so padded elements never leak to consumers.
    return y_pad.reshape(n_pad, 1)[:n, :]


def init_params(key):
    # Deterministic init mimicking nn.Linear(1, 1): U(-1/sqrt(fan_in), 1/sqrt(fan_in))
    kw, kb = jax.random.split(key)
    bound = 1.0  # fan_in = 1
    w = jax.random.uniform(kw, (1, 1), jnp.float32, -bound, bound)
    b = jax.random.uniform(kb, (1,), jnp.float32, -bound, bound)
    return w, b


if __name__ == "__main__":
    key = jax.random.PRNGKey(0)
    w, b = init_params(key)

    # Same input as the reference script: linspace(-1, 1, 100) with a feature dim.
    x = jnp.expand_dims(jnp.linspace(-1.0, 1.0, 100, dtype=jnp.float32), axis=1)  # (100, 1)

    y = linear_forward(x, w, b)
    y = jax.block_until_ready(y)

    # Sanity check against plain-JAX reference.
    y_ref = x @ w.T + b
    assert y.shape == (100, 1)
    assert jnp.allclose(y, y_ref, atol=1e-6), "mismatch vs reference"

    print("KERNEL_OK")
</pallas_src>

<mosaic_0001>
module attributes {stable_mosaic.version = 11 : i64} {
  func.func @_linear_kernel(%arg0: memref<2xf32, #tpu.memory_space<smem>>, %arg1: memref<1x128xf32, #tpu.memory_space<vmem>>, %arg2: memref<1x128xf32, #tpu.memory_space<vmem>>) attributes {dimension_semantics = [], scalar_prefetch = 0 : i64, scratch_operands = 0 : i64, tpu.core_type = #tpu.core_type<tc>} {
    %c0 = arith.constant 0 : index
    %0 = memref.load %arg0[%c0] : memref<2xf32, #tpu.memory_space<smem>>
    %c1 = arith.constant 1 : index
    %1 = memref.load %arg0[%c1] : memref<2xf32, #tpu.memory_space<smem>>
    %c0_0 = arith.constant 0 : index
    %c0_1 = arith.constant 0 : index
    %2 = vector.load %arg1[%c0_0, %c0_1] : memref<1x128xf32, #tpu.memory_space<vmem>>, vector<1x128xf32>
    %3 = vector.broadcast %0 : f32 to vector<1x128xf32>
    %4 = arith.mulf %2, %3 : vector<1x128xf32>
    %5 = vector.broadcast %1 : f32 to vector<1x128xf32>
    %6 = arith.addf %4, %5 : vector<1x128xf32>
    %c0_2 = arith.constant 0 : index
    %c0_3 = arith.constant 0 : index
    %7 = vector.load %arg2[%c0_2, %c0_3] : memref<1x128xf32, #tpu.memory_space<vmem>>, vector<1x128xf32>
    tpu.vector_store %arg2[%c0_2, %c0_3], %6 {strides = array<i32>} : memref<1x128xf32, #tpu.memory_space<vmem>>, vector<1x128xf32>,
    return
  }
}

</mosaic_0001>

<bundles_post_ra>
// kernel: tpu_custom_call.1
= control target key start
LH: loop header
LB: loop body
LE: loop exit
PB: predicated region body
PF: predicated region fallthrough
CT: control target
= control target key end

     0   :  { %7 = vsyncpa [#allocation4], 0  ;;  %s129_s0 = inlined_call_operand.hbm [shape: f32[2], index: 0, kind: input, shape index: {}]   ;;  %s130_s1 = inlined_call_operand.vmem [shape: f32[1,128], index: 1, kind: input, shape index: {}]   ;;  %s131_s2 = inlined_call_operand.hbm [shape: f32[1,128], index: 2, kind: output, shape index: {}]  }
   0x1   :  { %8 = vsyncpa [#allocation3], 0  ;;  %s49_s11 = scalar_lea.hbm %s129_s0, 16 }
   0x2   :  { %p50_p0 = scmp.ne.s32.totalorder %s129_s0, %s49_s11  ;;  %p53_p1 = scmp.lt.u32.totalorder %s49_s11, %s129_s0 }
   0x4   :  { %p55_p2 = pnand %p53_p1, %p50_p0 }
   0x6   :  { %58 = shalt.err (!%p55_p2)
}
   0x7   :  { %s85_s16 = smov [#allocation2]  }
   0x8   :  { %16 = dma.hbm_to_smem %s129_s0, 16, %s85_s16, [#allocation4]  }
   0x9   :  { %81 = dma.done.wait [#allocation4], 16  }
   0xa   :  { %82 = vsyncadd [#allocation4], 4294967280 }
   0xb   :  { %22 = sfence }
   0xc   :  { %s23_s19 = sld [smem:[#allocation2]]  ;;  %s46_s20 = sld [smem:[#allocation2 + $0x1]]  ;;  %v25_v0 = vld [vmem:[%s130_s1] sm:$0x1] }
   0xd   :  { %s86_s23 = smov [#allocation5]  }
   0xe   :  { %s37_s24 = sshll.u32 %s86_s23, 4  ;;  %s38_s24 = int_to_ptr.vmem [resolvable:$true] %s37_s24 }
   0xf   :  { %s59_s25 = scalar_lea.vmem %s38_s24, 16  ;;  %s63_s0 = scalar_lea.vmem %s38_s24, 32 }
  0x10   :  { %p60_p3 = scmp.ne.s32.totalorder %s38_s24, %s59_s25  ;;  %p64_p4 = scmp.lt.s32.totalorder %s38_s24, %s38_s24 }
  0x11   :  { %p65_p5 = scmp.lt.s32.totalorder %s63_s0, %s59_s25 }
  0x12   :  { %v26_v1 = vstv %s23_s19  ;;  %v28_v2 = vstv %s46_s20 }
  0x13   :  { %v27_v3 = vmul.f32 %v26_v1, %v25_v0  ;;  %p66_p6 = por %p65_p5, %p64_p4 }
  0x15   :  { %v29_v4 = vadd.f32 %v28_v2, %v27_v3  ;;  %p67_p7 = pnand %p66_p6, %p60_p3 }
  0x17   :  { %30 = vst [vmem:[#allocation5] sm:$0x1] %v29_v4 }
  0x18   :  { %70 = shalt.err (!%p67_p7)
}
  0x19   :  { %s71_s1 = scalar_lea.hbm %s131_s2, 16 }
  0x1a   :  { %p72_p8 = scmp.ne.s32.totalorder %s131_s2, %s71_s1  ;;  %p75_p9 = scmp.lt.u32.totalorder %s71_s1, %s131_s2 }
  0x1c   :  { %p77_p10 = pnand %p75_p9, %p72_p8 }
  0x1e   :  { %80 = shalt.err (!%p77_p10)
}
  0x1f   :  { %40 = dma.vmem_to_hbm [thread:$0]  %s38_s24, 16, %s131_s2, [#allocation3]  }
  0x20   :  { %83 = dma.done.wait [#allocation3], 16  }
  0x21   :  { %84 = vsyncadd [#allocation3], 4294967280 }
  0x22   :  { %44 = vsyncpa [#allocation3], 1 }
  0x23   :  { %45 = vsyncpa [#allocation4], 1 }

</bundles_post_ra>
